<compile_context>
chip_gen: v7x
topology: tpu7x:2x2x1
jax: 0.10.0
libtpu: 0.0.40
codegen_flags: <defaults>
</compile_context>

<pallas_src>
import functools

import jax
import jax.numpy as jnp
from jax.experimental import pallas as pl
from jax.experimental.pallas import tpu as pltpu

EPS = 1e-5


# --------------------------------------------------------------------------
# Pass 1: per-channel sum / sum-of-squares of x (BN1 batch statistics).
# --------------------------------------------------------------------------
def _bn1_stats_kernel(x_ref, sum_ref, sq_ref):
    @pl.when(pl.program_id(0) == 0)
    def _():
        sum_ref[...] = jnp.zeros_like(sum_ref)
        sq_ref[...] = jnp.zeros_like(sq_ref)

    x = x_ref[0]                                          # (Cin, HW) f32
    sum_ref[...] += jnp.sum(x, axis=1, keepdims=True)
    sq_ref[...] += jnp.sum(x * x, axis=1, keepdims=True)


# --------------------------------------------------------------------------
# Pass 2: BN2 batch statistics of h1 = conv1x1(relu(bn1(x))).
# --------------------------------------------------------------------------
def _bn2_stats_kernel(x_ref, s1_ref, t1_ref, w1t_ref, sum_ref, sq_ref):
    @pl.when(pl.program_id(0) == 0)
    def _():
        sum_ref[...] = jnp.zeros_like(sum_ref)
        sq_ref[...] = jnp.zeros_like(sq_ref)

    x = x_ref[0]                                          # (Cin, HW) f32
    a1 = jnp.maximum(x * s1_ref[...] + t1_ref[...], 0.0).astype(jnp.bfloat16)
    h1 = jnp.dot(w1t_ref[...], a1,
                 preferred_element_type=jnp.float32)      # (Cmid, HW) f32
    sum_ref[...] += jnp.sum(h1, axis=1, keepdims=True)
    sq_ref[...] += jnp.sum(h1 * h1, axis=1, keepdims=True)


# --------------------------------------------------------------------------
# Pass 3: full fused pipeline + 3x3 conv + identity copy, per image slab.
# --------------------------------------------------------------------------
def _bottleneck_apply_kernel(x_ref, pos_ref, s1_ref, t1_ref, w1t_ref,
                             s2_ref, t2_ref, w2t_ref, o_ref, *, cin, cg, h, w):
    hw = h * w
    x = x_ref[0]                                          # (Cin, HW) f32

    # Shortcut: exact (bit-identical) copy of the input channels.
    o_ref[0, 0:cin, :] = x.astype(o_ref.dtype)

    # BN1 (pre-folded scale/shift) + ReLU, then the 1x1 conv on the MXU.
    a1 = jnp.maximum(x * s1_ref[...] + t1_ref[...], 0.0).astype(jnp.bfloat16)
    h1 = jnp.dot(w1t_ref[...], a1,
                 preferred_element_type=jnp.float32)      # (Cmid, HW) f32

    # BN2 + ReLU, then the 3x3 conv as ONE (9*Cg, Cmid) @ (Cmid, HW) matmul.
    a2 = jnp.maximum(h1 * s2_ref[...] + t2_ref[...], 0.0).astype(jnp.bfloat16)
    taps = jnp.dot(w2t_ref[...], a2,
                   preferred_element_type=jnp.float32)    # (9*Cg, HW) f32

    # Output pixel p' receives tap (di,dj)'s value computed at source pixel
    # p' + (di-1)*W + (dj-1), when that source lies inside the image
    # (padding=1 => zero outside).  Shift = lane roll (XLU, otherwise idle);
    # out-of-image / wrapped positions are masked out.  Accumulate in vregs.
    ypos = pos_ref[0:1, :]                                # (1, HW) int32
    xpos = pos_ref[1:2, :]
    res = taps[4 * cg:5 * cg, :]                          # centre tap (1,1)
    for k in range(9):
        if k == 4:
            continue
        di, dj = divmod(k, 3)
        off = (di - 1) * w + (dj - 1)
        slab = pltpu.roll(taps[k * cg:(k + 1) * cg, :], (-off) % hw, axis=1)
        mask = None
        if di == 0:
            mask = ypos >= 1
        elif di == 2:
            mask = ypos <= h - 2
        if dj == 0:
            cmask = xpos >= 1
            mask = cmask if mask is None else jnp.logical_and(mask, cmask)
        elif dj == 2:
            cmask = xpos <= w - 2
            mask = cmask if mask is None else jnp.logical_and(mask, cmask)
        res = res + jnp.where(mask, slab, 0.0)

    o_ref[0, cin:cin + cg, :] = res.astype(o_ref.dtype)


# --------------------------------------------------------------------------
# Wrapper.
# --------------------------------------------------------------------------
def _fold_bn(gamma, beta, s, q, count):
    mu = s / count
    # TODO(synk): E[x^2]-E[x]^2 in f32 (clamped); use a Welford-style merge for
    # ill-conditioned inputs.
    var = jnp.maximum(q / count - mu * mu, 0.0)
    rstd = jax.lax.rsqrt(var + EPS)
    scale = gamma * rstd
    shift = beta - mu * scale
    return scale, shift


def bottleneck_forward(x_nchw, params):
    """forward(x) = cat([x, residual(x)], channel_dim) — x is NCHW."""
    g1, b1, w1, g2, b2, w2 = params
    n, cin, h, w = x_nchw.shape
    cmid = w1.shape[1]
    cg = w2.shape[-1]
    hw = h * w
    p = n * hw

    # Channels-first fused layout: free reshape, no transpose of x.
    x3 = x_nchw.reshape(n, cin, hw)

    # MXU-ready weights (bf16, channels-first):
    #   w1t[j, c]                 so  h1  = w1t @ a1
    #   w2t[(di*3+dj)*Cg + g, c]  so  taps = w2t @ a2
    w1t = jnp.transpose(w1, (1, 0)).astype(jnp.bfloat16)
    w2t = jnp.transpose(w2, (0, 1, 3, 2)).reshape(9 * cg, cmid).astype(jnp.bfloat16)

    # (y, x) coordinate of every flattened pixel -> 3x3 boundary masks.
    yy, xx = jnp.meshgrid(jnp.arange(h, dtype=jnp.int32),
                          jnp.arange(w, dtype=jnp.int32), indexing="ij")
    pos = jnp.stack([yy.reshape(hw), xx.reshape(hw)], axis=0)   # (2, HW)

    # Explicit VMEM budget from the per-image-slab footprint (review item).
    img_bytes = hw * (4 * cin + 2 * cin + 4 * cmid + 2 * cmid
                      + 4 * 9 * cg + 4 * cg + 4 * (cin + cg))
    vmem_limit = int(min(64 * 2 ** 20, max(24 * 2 ** 20, 4 * img_bytes)))

    img_spec = pl.BlockSpec((1, cin, hw), lambda i: (i, 0, 0))
    col_cin = pl.BlockSpec((cin, 1), lambda i: (0, 0))
    col_cmid = pl.BlockSpec((cmid, 1), lambda i: (0, 0))
    w1_spec = pl.BlockSpec((cmid, cin), lambda i: (0, 0))
    w2_spec = pl.BlockSpec((9 * cg, cmid), lambda i: (0, 0))
    pos_spec = pl.BlockSpec((2, hw), lambda i: (0, 0))

    reduce_params = pltpu.CompilerParams(
        dimension_semantics=("arbitrary",), vmem_limit_bytes=vmem_limit)
    apply_params = pltpu.CompilerParams(
        dimension_semantics=("parallel",), vmem_limit_bytes=vmem_limit)

    # ---- pass 1: BN1 batch statistics of x.
    s1, q1 = pl.pallas_call(
        _bn1_stats_kernel,
        grid=(n,),
        in_specs=[img_spec],
        out_specs=(col_cin, col_cin),
        out_shape=(jax.ShapeDtypeStruct((cin, 1), jnp.float32),
                   jax.ShapeDtypeStruct((cin, 1), jnp.float32)),
        compiler_params=reduce_params,
    )(x3)
    scale1, shift1 = _fold_bn(g1.reshape(cin, 1), b1.reshape(cin, 1), s1, q1, p)

    # ---- pass 2: BN2 batch statistics of h1 = conv1x1(relu(bn1(x))).
    s2, q2 = pl.pallas_call(
        _bn2_stats_kernel,
        grid=(n,),
        in_specs=[img_spec, col_cin, col_cin, w1_spec],
        out_specs=(col_cmid, col_cmid),
        out_shape=(jax.ShapeDtypeStruct((cmid, 1), jnp.float32),
                   jax.ShapeDtypeStruct((cmid, 1), jnp.float32)),
        compiler_params=reduce_params,
    )(x3, scale1, shift1, w1t)
    scale2, shift2 = _fold_bn(g2.reshape(cmid, 1), b2.reshape(cmid, 1), s2, q2, p)

    # ---- pass 3: full pipeline + 3x3 conv, written straight into the fused
    #              channels-first (N, Cin+Cg, H*W) output (identity + residual).
    cost = pl.CostEstimate(
        flops=2 * p * cin * cmid + 2 * p * cmid * 9 * cg,
        transcendentals=0,
        bytes_accessed=4 * p * cin + 4 * p * (cin + cg)
        + 2 * (cin * cmid + 9 * cg * cmid),
    )
    kernel = functools.partial(_bottleneck_apply_kernel,
                               cin=cin, cg=cg, h=h, w=w)
    out3 = pl.pallas_call(
        kernel,
        grid=(n,),
        in_specs=[img_spec, pos_spec, col_cin, col_cin, w1_spec,
                  col_cmid, col_cmid, w2_spec],
        out_specs=pl.BlockSpec((1, cin + cg, hw), lambda i: (i, 0, 0)),
        out_shape=jax.ShapeDtypeStruct((n, cin + cg, hw), jnp.float32),
        compiler_params=apply_params,
        cost_estimate=cost,
    )(x3, pos, scale1, shift1, w1t, scale2, shift2, w2t)

    # Free reshape back to NCHW; no transpose, no concatenate.
    return out3.reshape(n, cin + cg, h, w)


def bottleneck_reference(x_nchw, params):
    """Pure-JAX f32 reference (same training-mode BN semantics)."""
    g1, b1, w1, g2, b2, w2 = params
    x = jnp.transpose(x_nchw, (0, 2, 3, 1))
    mu1 = jnp.mean(x, axis=(0, 1, 2), keepdims=True)
    var1 = jnp.mean((x - mu1) ** 2, axis=(0, 1, 2), keepdims=True)
    a1 = jnp.maximum((x - mu1) / jnp.sqrt(var1 + EPS) * g1.reshape(1, 1, 1, -1)
                     + b1.reshape(1, 1, 1, -1), 0.0)
    h1 = jnp.einsum('nhwc,cd->nhwd', a1, w1)
    mu2 = jnp.mean(h1, axis=(0, 1, 2), keepdims=True)
    var2 = jnp.mean((h1 - mu2) ** 2, axis=(0, 1, 2), keepdims=True)
    a2 = jnp.maximum((h1 - mu2) / jnp.sqrt(var2 + EPS) * g2.reshape(1, 1, 1, -1)
                     + b2.reshape(1, 1, 1, -1), 0.0)
    res = jax.lax.conv_general_dilated(
        a2, w2, window_strides=(1, 1), padding='SAME',
        dimension_numbers=('NHWC', 'HWIO', 'NHWC'))
    res_nchw = jnp.transpose(res, (0, 3, 1, 2))
    return jnp.concatenate([x_nchw, res_nchw], axis=1)


if __name__ == "__main__":
    # Small deterministic problem: batch=2, in_channels=4, growth_rate=8, 16x16.
    N, CIN, H, W = 2, 4, 16, 16
    GROWTH = 8
    CMID = 4 * GROWTH      # inner_channels
    CG = GROWTH

    key = jax.random.PRNGKey(0)
    ks = jax.random.split(key, 7)
    x = jax.random.normal(ks[0], (N, CIN, H, W), jnp.float32)
    g1 = 1.0 + 0.1 * jax.random.normal(ks[1], (1, CIN), jnp.float32)
    b1 = 0.1 * jax.random.normal(ks[2], (1, CIN), jnp.float32)
    w1 = 0.1 * jax.random.normal(ks[3], (CIN, CMID), jnp.float32)
    g2 = 1.0 + 0.1 * jax.random.normal(ks[4], (1, CMID), jnp.float32)
    b2 = 0.1 * jax.random.normal(ks[5], (1, CMID), jnp.float32)
    w2 = 0.1 * jax.random.normal(ks[6], (3, 3, CMID, CG), jnp.float32)
    params = (g1, b1, w1, g2, b2, w2)

    out = jax.block_until_ready(jax.jit(bottleneck_forward)(x, params))
    ref = jax.block_until_ready(bottleneck_reference(x, params))

    assert out.shape == (N, CIN + GROWTH, H, W), out.shape
    assert bool(jnp.array_equal(out[:, :CIN], x)), "shortcut channels not exact"
    max_err = float(jnp.max(jnp.abs(out - ref)))
    assert jnp.allclose(out, ref, rtol=5e-2, atol=5e-2), max_err
    print("KERNEL_OK")
</pallas_src>

<mosaic_0001>
module attributes {stable_mosaic.version = 11 : i64} {
  func.func @_bn1_stats_kernel(%arg0: i32, %arg1: memref<1x4x256xf32, #tpu.memory_space<vmem>>, %arg2: memref<4x1xf32, #tpu.memory_space<vmem>>, %arg3: memref<4x1xf32, #tpu.memory_space<vmem>>) attributes {dimension_semantics = [#tpu.dimension_semantics<arbitrary>], iteration_bounds = array<i64: 2>, scalar_prefetch = 0 : i64, scratch_operands = 0 : i64, tpu.core_type = #tpu.core_type<tc>, window_params = [{transform_indices = @transform_0, window_bounds = array<i64: 1, 4, 256>}, {pipeline_mode = #tpu.pipeline_mode<synchronous>, transform_indices = @transform_1, window_bounds = array<i64: 4, 1>}, {pipeline_mode = #tpu.pipeline_mode<synchronous>, transform_indices = @transform_2, window_bounds = array<i64: 4, 1>}]} {
    %c0_i32 = arith.constant 0 : i32
    %0 = arith.cmpi eq, %arg0, %c0_i32 : i32
    %1 = arith.extui %0 : i1 to i32
    %c0_i32_0 = arith.constant 0 : i32
    %2 = arith.cmpi ne, %1, %c0_i32_0 : i32
    scf.if %2 {
      %cst_12 = arith.constant 0.000000e+00 : f32
      %16 = vector.broadcast %cst_12 : f32 to vector<4x1xf32>
      %c0_13 = arith.constant 0 : index
      %c0_14 = arith.constant 0 : index
      %17 = vector.load %arg2[%c0_13, %c0_14] : memref<4x1xf32, #tpu.memory_space<vmem>>, vector<4x1xf32>
      tpu.vector_store %arg2[%c0_13, %c0_14], %16 {strides = array<i32>} : memref<4x1xf32, #tpu.memory_space<vmem>>, vector<4x1xf32>,
      %cst_15 = arith.constant 0.000000e+00 : f32
      %18 = vector.broadcast %cst_15 : f32 to vector<4x1xf32>
      %c0_16 = arith.constant 0 : index
      %c0_17 = arith.constant 0 : index
      %19 = vector.load %arg3[%c0_16, %c0_17] : memref<4x1xf32, #tpu.memory_space<vmem>>, vector<4x1xf32>
      tpu.vector_store %arg3[%c0_16, %c0_17], %18 {strides = array<i32>} : memref<4x1xf32, #tpu.memory_space<vmem>>, vector<4x1xf32>,
    } else {
    }
    %c0 = arith.constant 0 : index
    %c0_1 = arith.constant 0 : index
    %c0_2 = arith.constant 0 : index
    %3 = vector.load %arg1[%c0, %c0_1, %c0_2] : memref<1x4x256xf32, #tpu.memory_space<vmem>>, vector<1x4x256xf32>
    %4 = vector.shape_cast %3 : vector<1x4x256xf32> to vector<4x256xf32>
    %c0_3 = arith.constant 0 : index
    %c0_4 = arith.constant 0 : index
    %5 = vector.load %arg2[%c0_3, %c0_4] : memref<4x1xf32, #tpu.memory_space<vmem>>, vector<4x1xf32>
    %cst = arith.constant dense<0.000000e+00> : vector<4xf32>
    %6 = vector.multi_reduction <add>, %4, %cst [1] : vector<4x256xf32> to vector<4xf32>
    %7 = vector.shape_cast %6 : vector<4xf32> to vector<4x1xf32>
    %8 = arith.addf %5, %7 : vector<4x1xf32>
    %c0_5 = arith.constant 0 : index
    %c0_6 = arith.constant 0 : index
    %9 = vector.load %arg2[%c0_5, %c0_6] : memref<4x1xf32, #tpu.memory_space<vmem>>, vector<4x1xf32>
    tpu.vector_store %arg2[%c0_5, %c0_6], %8 {strides = array<i32>} : memref<4x1xf32, #tpu.memory_space<vmem>>, vector<4x1xf32>,
    %c0_7 = arith.constant 0 : index
    %c0_8 = arith.constant 0 : index
    %10 = vector.load %arg3[%c0_7, %c0_8] : memref<4x1xf32, #tpu.memory_space<vmem>>, vector<4x1xf32>
    %11 = arith.mulf %4, %4 : vector<4x256xf32>
    %cst_9 = arith.constant dense<0.000000e+00> : vector<4xf32>
    %12 = vector.multi_reduction <add>, %11, %cst_9 [1] : vector<4x256xf32> to vector<4xf32>
    %13 = vector.shape_cast %12 : vector<4xf32> to vector<4x1xf32>
    %14 = arith.addf %10, %13 : vector<4x1xf32>
    %c0_10 = arith.constant 0 : index
    %c0_11 = arith.constant 0 : index
    %15 = vector.load %arg3[%c0_10, %c0_11] : memref<4x1xf32, #tpu.memory_space<vmem>>, vector<4x1xf32>
    tpu.vector_store %arg3[%c0_10, %c0_11], %14 {strides = array<i32>} : memref<4x1xf32, #tpu.memory_space<vmem>>, vector<4x1xf32>,
    return
  }
  func.func @transform_0(%arg0: i32) -> (i32, i32, i32) {
    %c0_i32 = arith.constant 0 : i32
    %c0_i32_0 = arith.constant 0 : i32
    %c0_i32_1 = arith.constant 0 : i32
    return %arg0, %c0_i32, %c0_i32_0 : i32, i32, i32
  }
  func.func @transform_1(%arg0: i32) -> (i32, i32) {
    %c0_i32 = arith.constant 0 : i32
    %c0_i32_0 = arith.constant 0 : i32
    %c0_i32_1 = arith.constant 0 : i32
    return %c0_i32, %c0_i32_0 : i32, i32
  }
  func.func @transform_2(%arg0: i32) -> (i32, i32) {
    %c0_i32 = arith.constant 0 : i32
    %c0_i32_0 = arith.constant 0 : i32
    %c0_i32_1 = arith.constant 0 : i32
    return %c0_i32, %c0_i32_0 : i32, i32
  }
}

module attributes {stable_mosaic.version = 11 : i64} {
  func.func @_bn2_stats_kernel(%arg0: i32, %arg1: memref<1x4x256xf32, #tpu.memory_space<vmem>>, %arg2: memref<4x1xf32, #tpu.memory_space<vmem>>, %arg3: memref<4x1xf32, #tpu.memory_space<vmem>>, %arg4: memref<32x4xbf16, #tpu.memory_space<vmem>>, %arg5: memref<32x1xf32, #tpu.memory_space<vmem>>, %arg6: memref<32x1xf32, #tpu.memory_space<vmem>>) attributes {dimension_semantics = [#tpu.dimension_semantics<arbitrary>], iteration_bounds = array<i64: 2>, scalar_prefetch = 0 : i64, scratch_operands = 0 : i64, tpu.core_type = #tpu.core_type<tc>, window_params = [{transform_indices = @transform_0, window_bounds = array<i64: 1, 4, 256>}, {pipeline_mode = #tpu.pipeline_mode<synchronous>, transform_indices = @transform_1, window_bounds = array<i64: 4, 1>}, {pipeline_mode = #tpu.pipeline_mode<synchronous>, transform_indices = @transform_2, window_bounds = array<i64: 4, 1>}, {pipeline_mode = #tpu.pipeline_mode<synchronous>, transform_indices = @transform_3, window_bounds = array<i64: 32, 4>}, {pipeline_mode = #tpu.pipeline_mode<synchronous>, transform_indices = @transform_4, window_bounds = array<i64: 32, 1>}, {pipeline_mode = #tpu.pipeline_mode<synchronous>, transform_indices = @transform_5, window_bounds = array<i64: 32, 1>}]} {
    %c0_i32 = arith.constant 0 : i32
    %0 = arith.cmpi eq, %arg0, %c0_i32 : i32
    %1 = arith.extui %0 : i1 to i32
    %c0_i32_0 = arith.constant 0 : i32
    %2 = arith.cmpi ne, %1, %c0_i32_0 : i32
    scf.if %2 {
      %cst_20 = arith.constant 0.000000e+00 : f32
      %27 = vector.broadcast %cst_20 : f32 to vector<32x1xf32>
      %c0_21 = arith.constant 0 : index
      %c0_22 = arith.constant 0 : index
      %28 = vector.load %arg5[%c0_21, %c0_22] : memref<32x1xf32, #tpu.memory_space<vmem>>, vector<32x1xf32>
      tpu.vector_store %arg5[%c0_21, %c0_22], %27 {strides = array<i32>} : memref<32x1xf32, #tpu.memory_space<vmem>>, vector<32x1xf32>,
      %cst_23 = arith.constant 0.000000e+00 : f32
      %29 = vector.broadcast %cst_23 : f32 to vector<32x1xf32>
      %c0_24 = arith.constant 0 : index
      %c0_25 = arith.constant 0 : index
      %30 = vector.load %arg6[%c0_24, %c0_25] : memref<32x1xf32, #tpu.memory_space<vmem>>, vector<32x1xf32>
      tpu.vector_store %arg6[%c0_24, %c0_25], %29 {strides = array<i32>} : memref<32x1xf32, #tpu.memory_space<vmem>>, vector<32x1xf32>,
    } else {
    }
    %c0 = arith.constant 0 : index
    %c0_1 = arith.constant 0 : index
    %c0_2 = arith.constant 0 : index
    %3 = vector.load %arg1[%c0, %c0_1, %c0_2] : memref<1x4x256xf32, #tpu.memory_space<vmem>>, vector<1x4x256xf32>
    %4 = vector.shape_cast %3 : vector<1x4x256xf32> to vector<4x256xf32>
    %c0_3 = arith.constant 0 : index
    %c0_4 = arith.constant 0 : index
    %5 = vector.load %arg2[%c0_3, %c0_4] : memref<4x1xf32, #tpu.memory_space<vmem>>, vector<4x1xf32>
    %6 = vector.broadcast %5 : vector<4x1xf32> to vector<4x256xf32>
    %7 = arith.mulf %4, %6 : vector<4x256xf32>
    %c0_5 = arith.constant 0 : index
    %c0_6 = arith.constant 0 : index
    %8 = vector.load %arg3[%c0_5, %c0_6] : memref<4x1xf32, #tpu.memory_space<vmem>>, vector<4x1xf32>
    %9 = vector.broadcast %8 : vector<4x1xf32> to vector<4x256xf32>
    %10 = arith.addf %7, %9 : vector<4x256xf32>
    %cst = arith.constant 0.000000e+00 : f32
    %11 = vector.broadcast %cst : f32 to vector<4x256xf32>
    %12 = arith.maximumf %10, %11 : vector<4x256xf32>
    %13 = arith.truncf %12 : vector<4x256xf32> to vector<4x256xbf16>
    %c0_7 = arith.constant 0 : index
    %c0_8 = arith.constant 0 : index
    %14 = vector.load %arg4[%c0_7, %c0_8] : memref<32x4xbf16, #tpu.memory_space<vmem>>, vector<32x4xbf16>
    %cst_9 = arith.constant dense<0.000000e+00> : vector<32x256xf32>
    %15 = tpu.matmul %14, %13, %cst_9 {dimension_numbers = #tpu.dot_dimension_numbers<[1], [0], [0], [1], [0, 0, 1, 1], [], []>} : vector<32x4xbf16>, vector<4x256xbf16>, vector<32x256xf32> -> vector<32x256xf32>
    %c0_10 = arith.constant 0 : index
    %c0_11 = arith.constant 0 : index
    %16 = vector.load %arg5[%c0_10, %c0_11] : memref<32x1xf32, #tpu.memory_space<vmem>>, vector<32x1xf32>
    %cst_12 = arith.constant dense<0.000000e+00> : vector<32xf32>
    %17 = vector.multi_reduction <add>, %15, %cst_12 [1] : vector<32x256xf32> to vector<32xf32>
    %18 = vector.shape_cast %17 : vector<32xf32> to vector<32x1xf32>
    %19 = arith.addf %16, %18 : vector<32x1xf32>
    %c0_13 = arith.constant 0 : index
    %c0_14 = arith.constant 0 : index
    %20 = vector.load %arg5[%c0_13, %c0_14] : memref<32x1xf32, #tpu.memory_space<vmem>>, vector<32x1xf32>
    tpu.vector_store %arg5[%c0_13, %c0_14], %19 {strides = array<i32>} : memref<32x1xf32, #tpu.memory_space<vmem>>, vector<32x1xf32>,
    %c0_15 = arith.constant 0 : index
    %c0_16 = arith.constant 0 : index
    %21 = vector.load %arg6[%c0_15, %c0_16] : memref<32x1xf32, #tpu.memory_space<vmem>>, vector<32x1xf32>
    %22 = arith.mulf %15, %15 : vector<32x256xf32>
    %cst_17 = arith.constant dense<0.000000e+00> : vector<32xf32>
    %23 = vector.multi_reduction <add>, %22, %cst_17 [1] : vector<32x256xf32> to vector<32xf32>
    %24 = vector.shape_cast %23 : vector<32xf32> to vector<32x1xf32>
    %25 = arith.addf %21, %24 : vector<32x1xf32>
    %c0_18 = arith.constant 0 : index
    %c0_19 = arith.constant 0 : index
    %26 = vector.load %arg6[%c0_18, %c0_19] : memref<32x1xf32, #tpu.memory_space<vmem>>, vector<32x1xf32>
    tpu.vector_store %arg6[%c0_18, %c0_19], %25 {strides = array<i32>} : memref<32x1xf32, #tpu.memory_space<vmem>>, vector<32x1xf32>,
    return
  }
  func.func @transform_0(%arg0: i32) -> (i32, i32, i32) {
    %c0_i32 = arith.constant 0 : i32
    %c0_i32_0 = arith.constant 0 : i32
    %c0_i32_1 = arith.constant 0 : i32
    return %arg0, %c0_i32, %c0_i32_0 : i32, i32, i32
  }
  func.func @transform_1(%arg0: i32) -> (i32, i32) {
    %c0_i32 = arith.constant 0 : i32
    %c0_i32_0 = arith.constant 0 : i32
    %c0_i32_1 = arith.constant 0 : i32
    return %c0_i32, %c0_i32_0 : i32, i32
  }
  func.func @transform_2(%arg0: i32) -> (i32, i32) {
    %c0_i32 = arith.constant 0 : i32
    %c0_i32_0 = arith.constant 0 : i32
    %c0_i32_1 = arith.constant 0 : i32
    return %c0_i32, %c0_i32_0 : i32, i32
  }
  func.func @transform_3(%arg0: i32) -> (i32, i32) {
    %c0_i32 = arith.constant 0 : i32
    %c0_i32_0 = arith.constant 0 : i32
    %c0_i32_1 = arith.constant 0 : i32
    return %c0_i32, %c0_i32_0 : i32, i32
  }
  func.func @transform_4(%arg0: i32) -> (i32, i32) {
    %c0_i32 = arith.constant 0 : i32
    %c0_i32_0 = arith.constant 0 : i32
    %c0_i32_1 = arith.constant 0 : i32
    return %c0_i32, %c0_i32_0 : i32, i32
  }
  func.func @transform_5(%arg0: i32) -> (i32, i32) {
    %c0_i32 = arith.constant 0 : i32
    %c0_i32_0 = arith.constant 0 : i32
    %c0_i32_1 = arith.constant 0 : i32
    return %c0_i32, %c0_i32_0 : i32, i32
  }
}

module attributes {stable_mosaic.version = 11 : i64} {
  func.func @_bottleneck_apply_kernel(%arg0: i32, %arg1: memref<1x4x256xf32, #tpu.memory_space<vmem>>, %arg2: memref<2x256xi32, #tpu.memory_space<vmem>>, %arg3: memref<4x1xf32, #tpu.memory_space<vmem>>, %arg4: memref<4x1xf32, #tpu.memory_space<vmem>>, %arg5: memref<32x4xbf16, #tpu.memory_space<vmem>>, %arg6: memref<32x1xf32, #tpu.memory_space<vmem>>, %arg7: memref<32x1xf32, #tpu.memory_space<vmem>>, %arg8: memref<72x32xbf16, #tpu.memory_space<vmem>>, %arg9: memref<1x12x256xf32, #tpu.memory_space<vmem>>) attributes {dimension_semantics = [#tpu.dimension_semantics<parallel>], iteration_bounds = array<i64: 2>, scalar_prefetch = 0 : i64, scratch_operands = 0 : i64, tpu.core_type = #tpu.core_type<tc>, window_params = [{transform_indices = @transform_0, window_bounds = array<i64: 1, 4, 256>}, {pipeline_mode = #tpu.pipeline_mode<synchronous>, transform_indices = @transform_1, window_bounds = array<i64: 2, 256>}, {pipeline_mode = #tpu.pipeline_mode<synchronous>, transform_indices = @transform_2, window_bounds = array<i64: 4, 1>}, {pipeline_mode = #tpu.pipeline_mode<synchronous>, transform_indices = @transform_3, window_bounds = array<i64: 4, 1>}, {pipeline_mode = #tpu.pipeline_mode<synchronous>, transform_indices = @transform_4, window_bounds = array<i64: 32, 4>}, {pipeline_mode = #tpu.pipeline_mode<synchronous>, transform_indices = @transform_5, window_bounds = array<i64: 32, 1>}, {pipeline_mode = #tpu.pipeline_mode<synchronous>, transform_indices = @transform_6, window_bounds = array<i64: 32, 1>}, {pipeline_mode = #tpu.pipeline_mode<synchronous>, transform_indices = @transform_7, window_bounds = array<i64: 72, 32>}, {transform_indices = @transform_8, window_bounds = array<i64: 1, 12, 256>}]} {
    %c0 = arith.constant 0 : index
    %c0_0 = arith.constant 0 : index
    %c0_1 = arith.constant 0 : index
    %0 = vector.load %arg1[%c0, %c0_0, %c0_1] : memref<1x4x256xf32, #tpu.memory_space<vmem>>, vector<1x4x256xf32>
    %1 = vector.shape_cast %0 : vector<1x4x256xf32> to vector<4x256xf32>
    %c0_2 = arith.constant 0 : index
    %c0_3 = arith.constant 0 : index
    %c0_4 = arith.constant 0 : index
    %2 = vector.load %arg9[%c0_2, %c0_3, %c0_4] : memref<1x12x256xf32, #tpu.memory_space<vmem>>, vector<1x4x256xf32>
    %3 = vector.shape_cast %2 : vector<1x4x256xf32> to vector<4x256xf32>
    %4 = vector.shape_cast %1 : vector<4x256xf32> to vector<1x4x256xf32>
    tpu.vector_store %arg9[%c0_2, %c0_3, %c0_4], %4 {strides = array<i32>} : memref<1x12x256xf32, #tpu.memory_space<vmem>>, vector<1x4x256xf32>,
    %c0_5 = arith.constant 0 : index
    %c0_6 = arith.constant 0 : index
    %5 = vector.load %arg3[%c0_5, %c0_6] : memref<4x1xf32, #tpu.memory_space<vmem>>, vector<4x1xf32>
    %6 = vector.broadcast %5 : vector<4x1xf32> to vector<4x256xf32>
    %7 = arith.mulf %1, %6 : vector<4x256xf32>
    %c0_7 = arith.constant 0 : index
    %c0_8 = arith.constant 0 : index
    %8 = vector.load %arg4[%c0_7, %c0_8] : memref<4x1xf32, #tpu.memory_space<vmem>>, vector<4x1xf32>
    %9 = vector.broadcast %8 : vector<4x1xf32> to vector<4x256xf32>
    %10 = arith.addf %7, %9 : vector<4x256xf32>
    %cst = arith.constant 0.000000e+00 : f32
    %11 = vector.broadcast %cst : f32 to vector<4x256xf32>
    %12 = arith.maximumf %10, %11 : vector<4x256xf32>
    %13 = arith.truncf %12 : vector<4x256xf32> to vector<4x256xbf16>
    %c0_9 = arith.constant 0 : index
    %c0_10 = arith.constant 0 : index
    %14 = vector.load %arg5[%c0_9, %c0_10] : memref<32x4xbf16, #tpu.memory_space<vmem>>, vector<32x4xbf16>
    %cst_11 = arith.constant dense<0.000000e+00> : vector<32x256xf32>
    %15 = tpu.matmul %14, %13, %cst_11 {dimension_numbers = #tpu.dot_dimension_numbers<[1], [0], [0], [1], [0, 0, 1, 1], [], []>} : vector<32x4xbf16>, vector<4x256xbf16>, vector<32x256xf32> -> vector<32x256xf32>
    %c0_12 = arith.constant 0 : index
    %c0_13 = arith.constant 0 : index
    %16 = vector.load %arg6[%c0_12, %c0_13] : memref<32x1xf32, #tpu.memory_space<vmem>>, vector<32x1xf32>
    %17 = vector.broadcast %16 : vector<32x1xf32> to vector<32x256xf32>
    %18 = arith.mulf %15, %17 : vector<32x256xf32>
    %c0_14 = arith.constant 0 : index
    %c0_15 = arith.constant 0 : index
    %19 = vector.load %arg7[%c0_14, %c0_15] : memref<32x1xf32, #tpu.memory_space<vmem>>, vector<32x1xf32>
    %20 = vector.broadcast %19 : vector<32x1xf32> to vector<32x256xf32>
    %21 = arith.addf %18, %20 : vector<32x256xf32>
    %cst_16 = arith.constant 0.000000e+00 : f32
    %22 = vector.broadcast %cst_16 : f32 to vector<32x256xf32>
    %23 = arith.maximumf %21, %22 : vector<32x256xf32>
    %24 = arith.truncf %23 : vector<32x256xf32> to vector<32x256xbf16>
    %c0_17 = arith.constant 0 : index
    %c0_18 = arith.constant 0 : index
    %25 = vector.load %arg8[%c0_17, %c0_18] : memref<72x32xbf16, #tpu.memory_space<vmem>>, vector<72x32xbf16>
    %cst_19 = arith.constant dense<0.000000e+00> : vector<72x256xf32>
    %26 = tpu.matmul %25, %24, %cst_19 {dimension_numbers = #tpu.dot_dimension_numbers<[1], [0], [0], [1], [0, 0, 1, 1], [], []>} : vector<72x32xbf16>, vector<32x256xbf16>, vector<72x256xf32> -> vector<72x256xf32>
    %c0_20 = arith.constant 0 : index
    %c0_21 = arith.constant 0 : index
    %27 = vector.load %arg2[%c0_20, %c0_21] : memref<2x256xi32, #tpu.memory_space<vmem>>, vector<1x256xi32>
    %c1 = arith.constant 1 : index
    %c0_22 = arith.constant 0 : index
    %28 = vector.load %arg2[%c1, %c0_22] : memref<2x256xi32, #tpu.memory_space<vmem>>, vector<1x256xi32>
    %29 = vector.extract_strided_slice %26 {offsets = [32, 0], sizes = [8, 256], strides = [1, 1]} : vector<72x256xf32> to vector<8x256xf32>
    %30 = vector.extract_strided_slice %26 {offsets = [0, 0], sizes = [8, 256], strides = [1, 1]} : vector<72x256xf32> to vector<8x256xf32>
    %c17_i32 = arith.constant 17 : i32
    %31 = tpu.dynamic_rotate %30 by %c17_i32 dim 1 : vector<8x256xf32>, i32 -> vector<8x256xf32>
    %c1_i32 = arith.constant 1 : i32
    %32 = vector.broadcast %c1_i32 : i32 to vector<1x256xi32>
    %33 = arith.cmpi sge, %27, %32 : vector<1x256xi32>
    %c1_i32_23 = arith.constant 1 : i32
    %34 = vector.broadcast %c1_i32_23 : i32 to vector<1x256xi32>
    %35 = arith.cmpi sge, %28, %34 : vector<1x256xi32>
    %36 = arith.andi %33, %35 : vector<1x256xi1>
    %cst_24 = arith.constant 0.000000e+00 : f32
    %37 = vector.shape_cast %36 : vector<1x256xi1> to vector<1x256xi1>
    %38 = vector.broadcast %37 : vector<1x256xi1> to vector<8x256xi1>
    %39 = vector.broadcast %cst_24 : f32 to vector<8x256xf32>
    %40 = arith.select %38, %31, %39 : vector<8x256xi1>, vector<8x256xf32>
    %41 = arith.addf %29, %40 : vector<8x256xf32>
    %42 = vector.extract_strided_slice %26 {offsets = [8, 0], sizes = [8, 256], strides = [1, 1]} : vector<72x256xf32> to vector<8x256xf32>
    %c16_i32 = arith.constant 16 : i32
    %43 = tpu.dynamic_rotate %42 by %c16_i32 dim 1 : vector<8x256xf32>, i32 -> vector<8x256xf32>
    %c1_i32_25 = arith.constant 1 : i32
    %44 = vector.broadcast %c1_i32_25 : i32 to vector<1x256xi32>
    %45 = arith.cmpi sge, %27, %44 : vector<1x256xi32>
    %cst_26 = arith.constant 0.000000e+00 : f32
    %46 = vector.shape_cast %45 : vector<1x256xi1> to vector<1x256xi1>
    %47 = vector.broadcast %46 : vector<1x256xi1> to vector<8x256xi1>
    %48 = vector.broadcast %cst_26 : f32 to vector<8x256xf32>
    %49 = arith.select %47, %43, %48 : vector<8x256xi1>, vector<8x256xf32>
    %50 = arith.addf %41, %49 : vector<8x256xf32>
    %51 = vector.extract_strided_slice %26 {offsets = [16, 0], sizes = [8, 256], strides = [1, 1]} : vector<72x256xf32> to vector<8x256xf32>
    %c15_i32 = arith.constant 15 : i32
    %52 = tpu.dynamic_rotate %51 by %c15_i32 dim 1 : vector<8x256xf32>, i32 -> vector<8x256xf32>
    %c1_i32_27 = arith.constant 1 : i32
    %53 = vector.broadcast %c1_i32_27 : i32 to vector<1x256xi32>
    %54 = arith.cmpi sge, %27, %53 : vector<1x256xi32>
    %c14_i32 = arith.constant 14 : i32
    %55 = vector.broadcast %c14_i32 : i32 to vector<1x256xi32>
    %56 = arith.cmpi sle, %28, %55 : vector<1x256xi32>
    %57 = arith.andi %54, %56 : vector<1x256xi1>
    %cst_28 = arith.constant 0.000000e+00 : f32
    %58 = vector.shape_cast %57 : vector<1x256xi1> to vector<1x256xi1>
    %59 = vector.broadcast %58 : vector<1x256xi1> to vector<8x256xi1>
    %60 = vector.broadcast %cst_28 : f32 to vector<8x256xf32>
    %61 = arith.select %59, %52, %60 : vector<8x256xi1>, vector<8x256xf32>
    %62 = arith.addf %50, %61 : vector<8x256xf32>
    %63 = vector.extract_strided_slice %26 {offsets = [24, 0], sizes = [8, 256], strides = [1, 1]} : vector<72x256xf32> to vector<8x256xf32>
    %c1_i32_29 = arith.constant 1 : i32
    %64 = tpu.dynamic_rotate %63 by %c1_i32_29 dim 1 : vector<8x256xf32>, i32 -> vector<8x256xf32>
    %c1_i32_30 = arith.constant 1 : i32
    %65 = vector.broadcast %c1_i32_30 : i32 to vector<1x256xi32>
    %66 = arith.cmpi sge, %28, %65 : vector<1x256xi32>
    %cst_31 = arith.constant 0.000000e+00 : f32
    %67 = vector.shape_cast %66 : vector<1x256xi1> to vector<1x256xi1>
    %68 = vector.broadcast %67 : vector<1x256xi1> to vector<8x256xi1>
    %69 = vector.broadcast %cst_31 : f32 to vector<8x256xf32>
    %70 = arith.select %68, %64, %69 : vector<8x256xi1>, vector<8x256xf32>
    %71 = arith.addf %62, %70 : vector<8x256xf32>
    %72 = vector.extract_strided_slice %26 {offsets = [40, 0], sizes = [8, 256], strides = [1, 1]} : vector<72x256xf32> to vector<8x256xf32>
    %c255_i32 = arith.constant 255 : i32
    %73 = tpu.dynamic_rotate %72 by %c255_i32 dim 1 : vector<8x256xf32>, i32 -> vector<8x256xf32>
    %c14_i32_32 = arith.constant 14 : i32
    %74 = vector.broadcast %c14_i32_32 : i32 to vector<1x256xi32>
    %75 = arith.cmpi sle, %28, %74 : vector<1x256xi32>
    %cst_33 = arith.constant 0.000000e+00 : f32
    %76 = vector.shape_cast %75 : vector<1x256xi1> to vector<1x256xi1>
    %77 = vector.broadcast %76 : vector<1x256xi1> to vector<8x256xi1>
    %78 = vector.broadcast %cst_33 : f32 to vector<8x256xf32>
    %79 = arith.select %77, %73, %78 : vector<8x256xi1>, vector<8x256xf32>
    %80 = arith.addf %71, %79 : vector<8x256xf32>
    %81 = vector.extract_strided_slice %26 {offsets = [48, 0], sizes = [8, 256], strides = [1, 1]} : vector<72x256xf32> to vector<8x256xf32>
    %c241_i32 = arith.constant 241 : i32
    %82 = tpu.dynamic_rotate %81 by %c241_i32 dim 1 : vector<8x256xf32>, i32 -> vector<8x256xf32>
    %c14_i32_34 = arith.constant 14 : i32
    %83 = vector.broadcast %c14_i32_34 : i32 to vector<1x256xi32>
    %84 = arith.cmpi sle, %27, %83 : vector<1x256xi32>
    %c1_i32_35 = arith.constant 1 : i32
    %85 = vector.broadcast %c1_i32_35 : i32 to vector<1x256xi32>
    %86 = arith.cmpi sge, %28, %85 : vector<1x256xi32>
    %87 = arith.andi %84, %86 : vector<1x256xi1>
    %cst_36 = arith.constant 0.000000e+00 : f32
    %88 = vector.shape_cast %87 : vector<1x256xi1> to vector<1x256xi1>
    %89 = vector.broadcast %88 : vector<1x256xi1> to vector<8x256xi1>
    %90 = vector.broadcast %cst_36 : f32 to vector<8x256xf32>
    %91 = arith.select %89, %82, %90 : vector<8x256xi1>, vector<8x256xf32>
    %92 = arith.addf %80, %91 : vector<8x256xf32>
    %93 = vector.extract_strided_slice %26 {offsets = [56, 0], sizes = [8, 256], strides = [1, 1]} : vector<72x256xf32> to vector<8x256xf32>
    %c240_i32 = arith.constant 240 : i32
    %94 = tpu.dynamic_rotate %93 by %c240_i32 dim 1 : vector<8x256xf32>, i32 -> vector<8x256xf32>
    %c14_i32_37 = arith.constant 14 : i32
    %95 = vector.broadcast %c14_i32_37 : i32 to vector<1x256xi32>
    %96 = arith.cmpi sle, %27, %95 : vector<1x256xi32>
    %cst_38 = arith.constant 0.000000e+00 : f32
    %97 = vector.shape_cast %96 : vector<1x256xi1> to vector<1x256xi1>
    %98 = vector.broadcast %97 : vector<1x256xi1> to vector<8x256xi1>
    %99 = vector.broadcast %cst_38 : f32 to vector<8x256xf32>
    %100 = arith.select %98, %94, %99 : vector<8x256xi1>, vector<8x256xf32>
    %101 = arith.addf %92, %100 : vector<8x256xf32>
    %102 = vector.extract_strided_slice %26 {offsets = [64, 0], sizes = [8, 256], strides = [1, 1]} : vector<72x256xf32> to vector<8x256xf32>
    %c239_i32 = arith.constant 239 : i32
    %103 = tpu.dynamic_rotate %102 by %c239_i32 dim 1 : vector<8x256xf32>, i32 -> vector<8x256xf32>
    %c14_i32_39 = arith.constant 14 : i32
    %104 = vector.broadcast %c14_i32_39 : i32 to vector<1x256xi32>
    %105 = arith.cmpi sle, %27, %104 : vector<1x256xi32>
    %c14_i32_40 = arith.constant 14 : i32
    %106 = vector.broadcast %c14_i32_40 : i32 to vector<1x256xi32>
    %107 = arith.cmpi sle, %28, %106 : vector<1x256xi32>
    %108 = arith.andi %105, %107 : vector<1x256xi1>
    %cst_41 = arith.constant 0.000000e+00 : f32
    %109 = vector.shape_cast %108 : vector<1x256xi1> to vector<1x256xi1>
    %110 = vector.broadcast %109 : vector<1x256xi1> to vector<8x256xi1>
    %111 = vector.broadcast %cst_41 : f32 to vector<8x256xf32>
    %112 = arith.select %110, %103, %111 : vector<8x256xi1>, vector<8x256xf32>
    %113 = arith.addf %101, %112 : vector<8x256xf32>
    %c0_42 = arith.constant 0 : index
    %c4 = arith.constant 4 : index
    %c0_43 = arith.constant 0 : index
    %114 = vector.load %arg9[%c0_42, %c4, %c0_43] : memref<1x12x256xf32, #tpu.memory_space<vmem>>, vector<1x8x256xf32>
    %115 = vector.shape_cast %114 : vector<1x8x256xf32> to vector<8x256xf32>
    %116 = vector.shape_cast %113 : vector<8x256xf32> to vector<1x8x256xf32>
    tpu.vector_store %arg9[%c0_42, %c4, %c0_43], %116 {strides = array<i32>} : memref<1x12x256xf32, #tpu.memory_space<vmem>>, vector<1x8x256xf32>,
    return
  }
  func.func @transform_0(%arg0: i32) -> (i32, i32, i32) {
    %c0_i32 = arith.constant 0 : i32
    %c0_i32_0 = arith.constant 0 : i32
    %c0_i32_1 = arith.constant 0 : i32
    return %arg0, %c0_i32, %c0_i32_0 : i32, i32, i32
  }
  func.func @transform_1(%arg0: i32) -> (i32, i32) {
    %c0_i32 = arith.constant 0 : i32
    %c0_i32_0 = arith.constant 0 : i32
    %c0_i32_1 = arith.constant 0 : i32
    return %c0_i32, %c0_i32_0 : i32, i32
  }
  func.func @transform_2(%arg0: i32) -> (i32, i32) {
    %c0_i32 = arith.constant 0 : i32
    %c0_i32_0 = arith.constant 0 : i32
    %c0_i32_1 = arith.constant 0 : i32
    return %c0_i32, %c0_i32_0 : i32, i32
  }
  func.func @transform_3(%arg0: i32) -> (i32, i32) {
    %c0_i32 = arith.constant 0 : i32
    %c0_i32_0 = arith.constant 0 : i32
    %c0_i32_1 = arith.constant 0 : i32
    return %c0_i32, %c0_i32_0 : i32, i32
  }
  func.func @transform_4(%arg0: i32) -> (i32, i32) {
    %c0_i32 = arith.constant 0 : i32
    %c0_i32_0 = arith.constant 0 : i32
    %c0_i32_1 = arith.constant 0 : i32
    return %c0_i32, %c0_i32_0 : i32, i32
  }
  func.func @transform_5(%arg0: i32) -> (i32, i32) {
    %c0_i32 = arith.constant 0 : i32
    %c0_i32_0 = arith.constant 0 : i32
    %c0_i32_1 = arith.constant 0 : i32
    return %c0_i32, %c0_i32_0 : i32, i32
  }
  func.func @transform_6(%arg0: i32) -> (i32, i32) {
    %c0_i32 = arith.constant 0 : i32
    %c0_i32_0 = arith.constant 0 : i32
    %c0_i32_1 = arith.constant 0 : i32
    return %c0_i32, %c0_i32_0 : i32, i32
  }
  func.func @transform_7(%arg0: i32) -> (i32, i32) {
    %c0_i32 = arith.constant 0 : i32
    %c0_i32_0 = arith.constant 0 : i32
    %c0_i32_1 = arith.constant 0 : i32
    return %c0_i32, %c0_i32_0 : i32, i32
  }
  func.func @transform_8(%arg0: i32) -> (i32, i32, i32) {
    %c0_i32 = arith.constant 0 : i32
    %c0_i32_0 = arith.constant 0 : i32
    %c0_i32_1 = arith.constant 0 : i32
    return %arg0, %c0_i32, %c0_i32_0 : i32, i32, i32
  }
}

</mosaic_0001>

<bundles_post_ra>
// kernel: bottleneck_forward.3
= control target key start
LH: loop header
LB: loop body
LE: loop exit
PB: predicated region body
PF: predicated region fallthrough
CT: control target
= control target key end

     0   :  { %s238_s9 = smov 0   ;;  %s270_s0 = inlined_call_operand.vmem [shape: f32[2,4,256], index: 0, kind: input, shape index: {}]   ;;  %s271_s1 = inlined_call_operand.vmem [shape: f32[4,1], index: 1, kind: output, shape index: {0}]   ;;  %s272_s2 = inlined_call_operand.vmem [shape: f32[4,1], index: 2, kind: output, shape index: {1}]  }
   0x1 LB: > { %s194_s10 = sadd.s32 4294967295, %s220_s9   ;;  %p197_p0 = scmp.ge.s32.totalorder %s220_s9, 1  ;;  %s220_s9 = sphi %s238_s9, %s13_s9  }
   0x2   : > { %p105_p1 = scmp.lt.s32.totalorder %s220_s9, 3 }
   0x4   : > { %p106_p2 = pnand %p197_p0, %p105_p1 }
   0x5   : > { %p122_p3 = scmp.lt.s32.totalorder (!%p106_p2), %s194_s10, 1  ;;  %p200_p4 = scmp.ne.s32.totalorder (!%p106_p2), %s194_s10, 0 }
   0x6   : > { %109 = sbr.rel (%p106_p2) target bundleno = 176 (0xb0), region = 24 }
   0xd   : > { %s123_s11 = scalar_select %p122_p3, %s194_s10, 1 }
   0xe   : > { %130 = sbr.rel (%p200_p4) target bundleno = 21 (0x15), region = 28  ;;  %vm131_vm0 = vcmask (!%p200_p4), 3072   ;;  %v222_v0 = vmov (!%p200_p4), 0.0  }
   0xf   : > { %s203_s12 = sshll.u32 %s123_s11, 3  ;;  %132 = vst.msk [vmem:[%s271_s1] sm:$0xf] (!%p200_p4), %vm131_vm0, %v222_v0  ;;  %133 = vst.msk [vmem:[%s272_s2] sm:$0xf] (!%p200_p4), %vm131_vm0, %v222_v0 }
  0x10   : > { %s126_s15 = scalar_lea.vmem %s270_s0, %s203_s12 }
  0x15 PF: > { %v134_v1 = vld [vmem:[%s126_s15] sm:$0xff]  ;;  %vm139_vm1 = vcmask 1043456   ;;  %vm146_vm2 = vcmask 3072  }
  0x16   : > { %v137_v2 = vcombine.high %v134_v1, %v134_v1  ;;  %v140_v3 = vsel %vm139_vm1, %v134_v1, 0.0  ;;  %v149_v4 = vmul.f32 %v134_v1, %v134_v1  ;;  %v135_v11 = vld [vmem:[%s271_s1] sm:$0xf] }
  0x17   : > { %v148_v14 = vld [vmem:[%s272_s2] sm:$0xf] }
  0x18   : > { %v141_v5 = vsel %vm139_vm1, %v137_v2, 0.0  ;;  %v151_v6 = vcombine.high %v149_v4, %v149_v4  ;;  %v153_v7 = vsel %vm139_vm1, %v149_v4, 0.0 }
  0x19   : > { %v142_v8 = vadd.f32 %v141_v5, %v140_v3 }
  0x1a   : > { %v154_v9 = vsel %vm139_vm1, %v151_v6, 0.0 }
  0x1b   : > { %143 = vadd.xlane.f32.xlu0 %v142_v8  ;;  %v155_v10 = vadd.f32 %v154_v9, %v153_v7 }
  0x1f   : > { %156 = vadd.xlane.f32.xlu0 %v155_v10 }
  0xa8   : > { %v144_v12 = vpop.xlane.xlu0 %143 }
  0xa9   : > { %v145_v13 = vadd.f32 %v144_v12, %v135_v11 }
  0xab   : > { %147 = vst.msk [vmem:[%s271_s1] sm:$0xf] %vm146_vm2, %v145_v13 }
  0xac   : > { %v157_v15 = vpop.xlane.xlu0 %156 }
  0xad   : > { %v158_v16 = vadd.f32 %v157_v15, %v148_v14 }
  0xaf   : > { %159 = vst.msk [vmem:[%s272_s2] sm:$0xf] %vm146_vm2, %v158_v16 }
  0xb0 PF: > { %s13_s9 = sadd.s32 1, %s220_s9  }
  0xb1   : > { %p10_p5 = scmp.ge.s32.totalorder %s13_s9, 4  }
  0xb3   :  { %12 = sbr.rel (!%p10_p5) target bundleno = 1 (0x1), region = 62 }

// kernel: bottleneck_forward.4
= control target key start
LH: loop header
LB: loop body
LE: loop exit
PB: predicated region body
PF: predicated region fallthrough
CT: control target
= control target key end

     0   :  { %s501_s18 = smov 0   ;;  %s607_s0 = inlined_call_operand.vmem [shape: f32[2,4,256], index: 0, kind: input, shape index: {}]   ;;  %s608_s1 = inlined_call_operand.vmem [shape: f32[4,1], index: 1, kind: input, shape index: {}]   ;;  %s609_s2 = inlined_call_operand.vmem [shape: f32[4,1], index: 2, kind: input, shape index: {}]   ;;  %s610_s3 = inlined_call_operand.vmem [shape: bf16[32,4], index: 3, kind: input, shape index: {}]   ;;  %s611_s4 = inlined_call_operand.vmem [shape: f32[32,1], index: 4, kind: output, shape index: {0}]   ;;  %s612_s5 = inlined_call_operand.vmem [shape: f32[32,1], index: 5, kind: output, shape index: {1}]  }
   0x1 LB: > { %s429_s19 = sadd.s32 4294967295, %s466_s18   ;;  %p432_p0 = scmp.ge.s32.totalorder %s466_s18, 1  ;;  %s466_s18 = sphi %s501_s18, %s16_s18  }
   0x2   : > { %p180_p1 = scmp.lt.s32.totalorder %s466_s18, 3 }
   0x4   : > { %p181_p2 = pnand %p432_p0, %p180_p1 }
   0x5   : > { %p203_p3 = scmp.lt.s32.totalorder (!%p181_p2), %s429_s19, 1  ;;  %p435_p4 = scmp.ne.s32.totalorder (!%p181_p2), %s429_s19, 0 }
   0x6   : > { %184 = sbr.rel (%p181_p2) target bundleno = 553 (0x229), region = 36 }
   0xd   : > { %s204_s20 = scalar_select %p203_p3, %s429_s19, 1 }
   0xe   : > { %212 = sbr.rel (%p435_p4) target bundleno = 21 (0x15), region = 40  ;;  %vm213_vm0 = vcmask (!%p435_p4), 7168   ;;  %v468_v0 = vmov (!%p435_p4), 0.0  }
   0xf   : > { %s443_s21 = sshll.u32 %s204_s20, 3  ;;  %214 = vst.msk [vmem:[%s611_s4] sm:$0xff] (!%p435_p4), %vm213_vm0, %v468_v0  ;;  %215 = vst.msk [vmem:[%s611_s4 + $0x8] sm:$0xff] (!%p435_p4), %vm213_vm0, %v468_v0 }
  0x10   : > { %s207_s24 = scalar_lea.vmem %s607_s0, %s443_s21  ;;  %216 = vst.msk [vmem:[%s611_s4 + $0x10] sm:$0xff] (!%p435_p4), %vm213_vm0, %v468_v0  ;;  %217 = vst.msk [vmem:[%s611_s4 + $0x18] sm:$0xff] (!%p435_p4), %vm213_vm0, %v468_v0 }
  0x11   : > { %218 = vst.msk [vmem:[%s612_s5] sm:$0xff] (!%p435_p4), %vm213_vm0, %v468_v0  ;;  %219 = vst.msk [vmem:[%s612_s5 + $0x8] sm:$0xff] (!%p435_p4), %vm213_vm0, %v468_v0 }
  0x12   : > { %220 = vst.msk [vmem:[%s612_s5 + $0x10] sm:$0xff] (!%p435_p4), %vm213_vm0, %v468_v0  ;;  %221 = vst.msk [vmem:[%s612_s5 + $0x18] sm:$0xff] (!%p435_p4), %vm213_vm0, %v468_v0 }
  0x15 PF: > { %v223_v1 = vld [vmem:[%s608_s1] sm:$0xf]  ;;  %v469_v2 = vmov 0   ;;  %v470_v4 = vmov 839922192   ;;  %v231_v6 = vlaneseq  ;;  %vm278_vm1 = vcmask 1041408  }
  0x16   : > { %457 = vset.pattern.permute.xlu0 %v469_v2  ;;  %317 = vmatprep.mubr.bf16.mxu0 %v469_v2  ;;  %v237_v3 = vld [vmem:[%s609_s2] sm:$0xf]  ;;  %v229_v5 = vunpack.c.l.s4 %v470_v4  ;;  %v459_v23 = vld [vmem:[%s610_s3 + $0x8] sm:$0xff]   ;;  %vm271_vm2 = vcmask 31744   ;;  %vm358_vm3 = vcmask 7168  }
  0x17   : > { %226 = vperm.xlu0 %457, %v223_v1   ;;  %327 = vmatprep.mubr.bf16.mxu1 %v469_v2  ;;  %v232_v8 = vshrl.u32 %v231_v6, 7  ;;  %v222_v12 = vld [vmem:[%s207_s24] sm:$0xff]  ;;  %v340_v49 = vld [vmem:[%s611_s4 + $0x10] sm:$0xff]  ;;  %v339_v53 = vld [vmem:[%s611_s4 + $0x8] sm:$0xff] }
  0x18   : > { %v230_v7 = vunpack.c.0.s8 %v229_v5  ;;  %v458_v22 = vld [vmem:[%s610_s3] sm:$0xff]   ;;  %v341_v57 = vld [vmem:[%s611_s4 + $0x18] sm:$0xff]  ;;  %v364_v2 = vld [vmem:[%s612_s5 + $0x8] sm:$0xff] }
  0x19   : > { %v338_v48 = vld [vmem:[%s611_s4] sm:$0xff]  ;;  %v365_v63 = vld [vmem:[%s612_s5 + $0x10] sm:$0xff]  ;;  %v366_v5 = vld [vmem:[%s612_s5 + $0x18] sm:$0xff] }
  0x1a   : > { %v233_v9 = vsub.s32 %v230_v7, %v232_v8  ;;  %v363_v60 = vld [vmem:[%s612_s5] sm:$0xff] }
  0x1b   : > { %240 = vperm.xlu0 %457, %v237_v3  }
  0x96   : > { %v227_v10 = vpop.permute.xlu0 %226 }
  0x97   : > { %v234_v11 = vrot.slane %v227_v10, %v233_v9 }
  0x99   : > { %v236_v14 = vmul.f32 %v234_v11, %v222_v12 }
  0x9a   : > { %v241_v13 = vpop.permute.xlu0 %240 }
  0x9b   : > { %v248_v15 = vrot.slane %v241_v13, %v233_v9 }
  0x9d   : > { %v250_v16 = vadd.f32 %v248_v15, %v236_v14 }
  0x9f   : > { %v251_v17 = vmax.f32 %v250_v16, 0.0 }
  0xa1   : > { %v253_v18 = vcombine.high %v251_v17, %v251_v17  ;;  %v255_v19 = vpack.c.bf16 %v251_v17, %v251_v17 }
  0xa3   : > { %v256_v20 = vpack.c.bf16 %v253_v18, %v253_v18  ;;  %v280_v21 = vsel %vm278_vm1, %v255_v19, 0 }
  0xa5   : > { %438 = vmatprep.subr.msk.bf16.mxu0 %vm278_vm1, %v256_v20  ;;  %444 = vmatprep.subr.msk.bf16.mxu1 %vm278_vm1, %v256_v20 }
  0xa6   : > { %286 = vmatpush1.bf16.msra.mxu0 %v280_v21  ;;  %445 = vmatpush1.bf16.msra.mxu1 %v280_v21 }
  0xa9   : > { %439 = vmatmul.mubr.msk.bf16.vlgmr.msra.gmra.mrb[0].mxu0 %vm271_vm2, %v458_v22  ;;  %440 = vmatmul.mubr.msk.bf16.vlgmr.msra.gmra.mrb[0].mxu1 %vm271_vm2, %v459_v23 }
 0x17c   : > { %v319_v24 = vpop.f32.mrb[0].mxu0  ;;  %v329_v25 = vpop.f32.mrb[0].mxu1 }
 0x17d   : > { %v367_v26 = vmul.f32 %v319_v24, %v319_v24  ;;  %v321_v27 = vpop.f32.mrb[1].mxu0  ;;  %v371_v28 = vmul.f32 %v329_v25, %v329_v25  ;;  %v331_v29 = vpop.f32.mrb[1].mxu1 }
 0x17e   : > { %v368_v30 = vmul.f32 %v321_v27, %v321_v27  ;;  %v323_v31 = vpop.f32.mrb[2].mxu0  ;;  %v372_v32 = vmul.f32 %v331_v29, %v331_v29  ;;  %v342_v33 = vadd.f32 %v321_v27, %v319_v24  ;;  %v333_v34 = vpop.f32.mrb[2].mxu1  ;;  %v348_v35 = vadd.f32 %v331_v29, %v329_v25 }
 0x17f   : > { %v369_v36 = vmul.f32 %v323_v31, %v323_v31  ;;  %v325_v37 = vpop.f32.mrb[3].mxu0  ;;  %v373_v38 = vmul.f32 %v333_v34, %v333_v34  ;;  %v335_v39 = vpop.f32.mrb[3].mxu1 }
 0x180   : > { %v345_v40 = vadd.f32 %v325_v37, %v323_v31  ;;  %v370_v41 = vmul.f32 %v325_v37, %v325_v37  ;;  %343 = vadd.xlane.f32.xlu1 %v342_v33  ;;  %v351_v42 = vadd.f32 %v335_v39, %v333_v34  ;;  %v374_v43 = vmul.f32 %v335_v39, %v335_v39 }
 0x181   : > { %349 = vadd.xlane.f32.xlu0 %v348_v35  ;;  %v375_v44 = vadd.f32 %v368_v30, %v367_v26  ;;  %v381_v45 = vadd.f32 %v372_v32, %v371_v28 }
 0x182   : > { %v378_v46 = vadd.f32 %v370_v41, %v369_v36  ;;  %v384_v47 = vadd.f32 %v374_v43, %v373_v38 }
 0x184   : > { %346 = vadd.xlane.f32.xlu1 %v345_v40 }
 0x188   : > { %352 = vadd.xlane.f32.xlu1 %v351_v42 }
 0x18c   : > { %376 = vadd.xlane.f32.xlu1 %v375_v44 }
 0x190   : > { %382 = vadd.xlane.f32.xlu1 %v381_v45 }
 0x194   : > { %379 = vadd.xlane.f32.xlu1 %v378_v46 }
 0x198   : > { %385 = vadd.xlane.f32.xlu1 %v384_v47 }
 0x20d   : > { %v344_v50 = vpop.xlane.xlu1 %343 }
 0x20e   : > { %v354_v51 = vadd.f32 %v344_v50, %v338_v48  ;;  %v350_v52 = vpop.xlane.xlu0 %349 }
 0x20f   : > { %v356_v54 = vadd.f32 %v350_v52, %v340_v49 }
 0x210   : > { %359 = vst.msk [vmem:[%s611_s4] sm:$0xff] %vm358_vm3, %v354_v51 }
 0x211   : > { %v347_v55 = vpop.xlane.xlu1 %346  ;;  %361 = vst.msk [vmem:[%s611_s4 + $0x10] sm:$0xff] %vm358_vm3, %v356_v54 }
 0x212   : > { %v355_v56 = vadd.f32 %v347_v55, %v339_v53 }
 0x214   : > { %360 = vst.msk [vmem:[%s611_s4 + $0x8] sm:$0xff] %vm358_vm3, %v355_v56 }
 0x215   : > { %v353_v58 = vpop.xlane.xlu1 %352 }
 0x216   : > { %v357_v59 = vadd.f32 %v353_v58, %v341_v57 }
 0x218   : > { %362 = vst.msk [vmem:[%s611_s4 + $0x18] sm:$0xff] %vm358_vm3, %v357_v59 }
 0x219   : > { %v377_v61 = vpop.xlane.xlu1 %376 }
 0x21a   : > { %v387_v62 = vadd.f32 %v377_v61, %v363_v60 }
 0x21c   : > { %391 = vst.msk [vmem:[%s612_s5] sm:$0xff] %vm358_vm3, %v387_v62 }
 0x21d   : > { %v383_v0 = vpop.xlane.xlu1 %382 }
 0x21e   : > { %v389_v1 = vadd.f32 %v383_v0, %v365_v63 }
 0x220   : > { %393 = vst.msk [vmem:[%s612_s5 + $0x10] sm:$0xff] %vm358_vm3, %v389_v1 }
 0x221   : > { %v380_v3 = vpop.xlane.xlu1 %379 }
 0x222   : > { %v388_v4 = vadd.f32 %v380_v3, %v364_v2 }
 0x224   : > { %392 = vst.msk [vmem:[%s612_s5 + $0x8] sm:$0xff] %vm358_vm3, %v388_v4 }
 0x225   : > { %v386_v6 = vpop.xlane.xlu1 %385 }
 0x226   : > { %v390_v7 = vadd.f32 %v386_v6, %v366_v5 }
 0x228   : > { %394 = vst.msk [vmem:[%s612_s5 + $0x18] sm:$0xff] %vm358_vm3, %v390_v7 }
 0x229 PF: > { %s16_s18 = sadd.s32 1, %s466_s18  }
 0x22a   : > { %p13_p5 = scmp.ge.s32.totalorder %s16_s18, 4  }
 0x22c   :  { %15 = sbr.rel (!%p13_p5) target bundleno = 1 (0x1), region = 74 }

// kernel: bottleneck_forward.5
= control target key start
LH: loop header
LB: loop body
LE: loop exit
PB: predicated region body
PF: predicated region fallthrough
CT: control target
= control target key end

     0   :  { %s1011_s27 = smov 0   ;;  %s1215_s0 = inlined_call_operand.vmem [shape: f32[2,4,256], index: 0, kind: input, shape index: {}]   ;;  %s1216_s1 = inlined_call_operand.vmem [shape: s32[2,256], index: 1, kind: input, shape index: {}]   ;;  %s1217_s2 = inlined_call_operand.vmem [shape: f32[4,1], index: 2, kind: input, shape index: {}]   ;;  %s1218_s3 = inlined_call_operand.vmem [shape: f32[4,1], index: 3, kind: input, shape index: {}]   ;;  %s1219_s4 = inlined_call_operand.vmem [shape: bf16[32,4], index: 4, kind: input, shape index: {}]   ;;  %s1220_s5 = inlined_call_operand.vmem [shape: f32[32,1], index: 5, kind: input, shape index: {}]   ;;  %s1221_s6 = inlined_call_operand.vmem [shape: f32[32,1], index: 6, kind: input, shape index: {}]   ;;  %s1222_s7 = inlined_call_operand.vmem [shape: bf16[72,32], index: 7, kind: input, shape index: {}]   ;;  %s1223_s8 = inlined_call_operand.vmem [shape: f32[2,12,256], index: 8, kind: output, shape index: {}]  }
   0x1 LB: > { %s887_s28 = sadd.s32 4294967295, %s954_s27   ;;  %p891_p0 = scmp.ge.s32.totalorder %s954_s27, 1  ;;  %s954_s27 = sphi %s1011_s27, %s18_s27  }
   0x2   : > { %p262_p1 = scmp.lt.s32.totalorder %s954_s27, 3 }
   0x4   : > { %p263_p2 = pnand %p891_p0, %p262_p1 }
   0x5   : > { %v313_v0 = vld [vmem:[%s1217_s2] sm:$0xf] (!%p263_p2)  ;;  %v956_v1 = vmov (!%p263_p2), 0   ;;  %p296_p3 = scmp.lt.s32.totalorder (!%p263_p2), %s887_s28, 1  ;;  %v430_v6 = vld [vmem:[%s1220_s5 + $0x10] sm:$0xff] (!%p263_p2)  ;;  %v429_v9 = vld [vmem:[%s1220_s5 + $0x8] sm:$0xff] (!%p263_p2)  ;;  %v321_v15 = vlaneseq (!%p263_p2) }
   0x6   : > { %266 = sbr.rel (%p263_p2) target bundleno = 751 (0x2ef), region = 52  ;;  %938 = vset.pattern.permute.xlu0 (!%p263_p2), %v956_v1  ;;  %407 = vmatprep.mubr.bf16.mxu0 (!%p263_p2), %v956_v1  ;;  %v327_v2 = vld [vmem:[%s1218_s3] sm:$0xf] (!%p263_p2)  ;;  %v462_v7 = vld [vmem:[%s1221_s6 + $0x10] sm:$0xff] (!%p263_p2)  ;;  %v461_v10 = vld [vmem:[%s1221_s6 + $0x8] sm:$0xff] (!%p263_p2)  ;;  %vm368_vm0 = vcmask (!%p263_p2), 1041408  }
   0x7   : > { %316 = vperm.xlu0 (!%p263_p2), %938, %v313_v0   ;;  %939 = vset.pattern.permute.xlu1 (!%p263_p2), %v956_v1  ;;  %v460_v3 = vld [vmem:[%s1221_s6] sm:$0xff] (!%p263_p2)  ;;  %v431_v11 = vld [vmem:[%s1220_s5 + $0x18] sm:$0xff] (!%p263_p2)  ;;  %v957_v13 = vmov (!%p263_p2), 839922192   ;;  %v1064_v17 = vshrl.u32 (!%p263_p2), %v321_v15, 7  ;;  %vm361_vm1 = vcmask (!%p263_p2), 31744  }
   0x8   : > { %594 = vmatprep.mubr.bf16.mxu1 (!%p263_p2), %v956_v1  ;;  %v428_v8 = vld [vmem:[%s1220_s5] sm:$0xff] (!%p263_p2)  ;;  %v463_v12 = vld [vmem:[%s1221_s6 + $0x18] sm:$0xff] (!%p263_p2)  ;;  %v319_v14 = vunpack.c.l.s4 (!%p263_p2), %v957_v13  ;;  %v942_v31 = vld [vmem:[%s1219_s4 + $0x8] sm:$0xff] (!%p263_p2)   ;;  %vm536_vm2 = vcmask (!%p263_p2), 261120   ;;  %s958_s30 = smov (!%p263_p2), 17   ;;  %s959_s9 = smov (!%p263_p2), 15  }
   0x9   : > { %434 = vperm.xlu1 (!%p263_p2), %939, %v428_v8   ;;  %v941_v30 = vld [vmem:[%s1219_s4] sm:$0xff] (!%p263_p2)   ;;  %s960_s10 = smov (!%p263_p2), 16   ;;  %s961_s11 = smov (!%p263_p2), 1  }
   0xa   : > { %v320_v16 = vunpack.c.0.s8 (!%p263_p2), %v319_v14  ;;  %v943_v13 = vld [vmem:[%s1222_s7] sm:$0xff] (!%p263_p2)   ;;  %v944_v14 = vld [vmem:[%s1222_s7 + $0x8] sm:$0xff] (!%p263_p2)   ;;  %s962_s12 = smov (!%p263_p2), 127   ;;  %s965_s15 = smov (!%p263_p2), 111  }
   0xb   : > { %330 = vperm.xlu0 (!%p263_p2), %938, %v327_v2  }
   0xc   : > { %v323_v18 = vsub.s32 (!%p263_p2), %v320_v16, %v1064_v17  ;;  %v945_v16 = vld [vmem:[%s1222_s7 + $0x10] sm:$0xff] (!%p263_p2)  }
   0xd   : > { %s1235_s28 = smov (!%p296_p3, %s887_s28), 1  ;;  %439 = vperm.xlu1 %939, %v429_v9  }
   0xe   : > { %s914_s13 = sshll.u32 %s1235_s28, 3  ;;  %s915_s14 = sshll.u32 %s1235_s28, 5 }
   0xf   : > { %s300_s17 = scalar_lea.vmem %s1215_s0, %s914_s13  ;;  %s1038_s20 = scalar_lea.vmem %s1223_s8, %s915_s14  ;;  %466 = vperm.xlu0 %938, %v460_v3  }
  0x10   : > { %v307_v4 = vld [vmem:[%s300_s17] sm:$0xff]  ;;  %s963_s13 = smov 113   ;;  %s964_s14 = smov 112  }
  0x11   : > { %v309_v5 = vcombine.high %v307_v4, %v307_v4  ;;  %311 = vst [vmem:[%s1038_s20] sm:$0xf] %v307_v4  ;;  %471 = vperm.xlu1 %939, %v461_v10  }
  0x13   : > { %312 = vst [vmem:[%s1038_s20 + $0x8] sm:$0xf] %v309_v5  ;;  %444 = vperm.xlu0 %938, %v430_v6  }
  0x15   : > { %449 = vperm.xlu1 %939, %v431_v11  }
  0x17   : > { %476 = vperm.xlu0 %938, %v462_v7  }
  0x19   : > { %481 = vperm.xlu1 %939, %v463_v12  }
  0x86   : > { %v317_v19 = vpop.permute.xlu0 %316 }
  0x87   : > { %v324_v20 = vrot.slane %v317_v19, %v323_v18  ;;  %v947_v19 = vld [vmem:[%s1222_s7 + $0x20] ss:$0 sps:$4 sm:$0xff]  }
  0x88   : > { %v435_v32 = vpop.permute.xlu1 %434 }
  0x89   : > { %v326_v22 = vmul.f32 %v324_v20, %v307_v4 }
  0x8a   : > { %v331_v21 = vpop.permute.xlu0 %330 }
  0x8b   : > { %v338_v23 = vrot.slane %v331_v21, %v323_v18  ;;  %v946_v18 = vld [vmem:[%s1222_s7 + $0x18] sm:$0xff]  }
  0x8c   : > { %v440_v33 = vpop.permute.xlu1 %439 }
  0x8d   : > { %v340_v24 = vadd.f32 %v338_v23, %v326_v22 }
  0x8e   : > { %v467_v34 = vpop.permute.xlu0 %466 }
  0x8f   : > { %v341_v25 = vmax.f32 %v340_v24, 0.0 }
  0x90   : > { %v472_v35 = vpop.permute.xlu1 %471 }
  0x91   : > { %v343_v26 = vcombine.high %v341_v25, %v341_v25  ;;  %v345_v27 = vpack.c.bf16 %v341_v25, %v341_v25 }
  0x92   : > { %v445_v44 = vpop.permute.xlu0 %444 }
  0x93   : > { %v346_v28 = vpack.c.bf16 %v343_v26, %v343_v26  ;;  %v370_v29 = vsel %vm368_vm0, %v345_v27, 0 }
  0x94   : > { %v450_v48 = vpop.permute.xlu1 %449 }
  0x95   : > { %898 = vmatprep.subr.msk.bf16.mxu0 %vm368_vm0, %v346_v28 }
  0x96   : > { %376 = vmatpush1.bf16.msra.mxu0 %v370_v29  ;;  %v477_v58 = vpop.permute.xlu0 %476 }
  0x98   : > { %v482_v2 = vpop.permute.xlu1 %481 }
  0x99   : > { %899 = vmatmul.mubr.msk.bf16.vlgmr.msra.gmra.mrb[0].mxu0 %vm361_vm1, %v941_v30 }
  0x9a   : > { %417 = vmatprep.mubr.bf16.mxu0 %v956_v1 }
  0xa1   : > { %900 = vmatmul.mubr.msk.bf16.gmra.mrb[4].mxu0 %vm361_vm1, %v942_v31 }
  0xa2   : > { %584 = vmatprep.mubr.bf16.mxu0 %v956_v1 }
 0x16c   : > { %v409_v36 = vpop.f32.mrb[0].mxu0 }
 0x16d   : > { %v452_v37 = vmul.f32 %v435_v32, %v409_v36  ;;  %v411_v38 = vpop.f32.mrb[1].mxu0 }
 0x16e   : > { %v453_v39 = vmul.f32 %v435_v32, %v411_v38  ;;  %v413_v40 = vpop.f32.mrb[2].mxu0 }
 0x16f   : > { %v484_v41 = vadd.f32 %v467_v34, %v452_v37  ;;  %v454_v42 = vmul.f32 %v440_v33, %v413_v40  ;;  %v415_v43 = vpop.f32.mrb[3].mxu0  ;;  %v1096_v40 = vld [vmem:[%s1216_s1] ss:$2 sm:$0x3] }
 0x170   : > { %v485_v45 = vadd.f32 %v467_v34, %v453_v39  ;;  %v455_v46 = vmul.f32 %v440_v33, %v415_v43  ;;  %vm645_vm3 = vcmp.ge.s32.totalorder %v1096_v40, 1  ;;  %v1114_v43 = vsub.s32 1, %v1064_v17 }
 0x171   : > { %v486_v47 = vadd.f32 %v472_v35, %v454_v42  ;;  %v492_v50 = vmax.f32 %v484_v41, 0.0  ;;  %v1101_v41 = vld [vmem:[%s1216_s1 + $0x1] ss:$2 sm:$0x3]  ;;  %v1111_v42 = vsub.s32 0, %v1064_v17  ;;  %vm760_vm14 = vcmp.le.s32.totalorder %v1096_v40, 14 }
 0x172   : > { %v487_v49 = vadd.f32 %v472_v35, %v455_v46  ;;  %v493_v52 = vmax.f32 %v485_v45, 0.0  ;;  %vm646_vm4 = vcmp.ge.s32.totalorder %v1101_v41, 1  ;;  %vm692_vm5 = vcmp.le.s32.totalorder %v1101_v41, 14 }
 0x173   : > { %v494_v51 = vmax.f32 %v486_v47, 0.0  ;;  %vm647_vm6 = vmand %vm645_vm3, %vm646_vm4  ;;  %v1122_v45 = vand.u32 127, %v321_v15  ;;  %v670_v15 = vsel %vm645_vm3, 1, %v956_v1 }
 0x174   : > { %v495_v53 = vmax.f32 %v487_v49, 0.0  ;;  %v419_v54 = vpop.f32.mrb[4].mxu0  ;;  %vm693_vm7 = vmand %vm645_vm3, %vm692_vm5 }
 0x175   : > { %v500_v55 = vpack.c.bf16 %v494_v51, %v492_v50  ;;  %v456_v56 = vmul.f32 %v445_v44, %v419_v54  ;;  %v421_v57 = vpop.f32.mrb[5].mxu0  ;;  %v694_v46 = vsel %vm693_vm7, 1, %v956_v1  ;;  %vm642_vm8 = vcmp.lt.s32.totalorder %v1122_v45, 17 }
 0x176   : > { %v457_v59 = vmul.f32 %v445_v44, %v421_v57  ;;  %v423_v60 = vpop.f32.mrb[6].mxu0  ;;  %v501_v61 = vpack.c.bf16 %v495_v53, %v493_v52  ;;  %v648_v44 = vsel %vm647_vm6, 1, %v956_v1  ;;  %v698_v49 = vrot.slane %v694_v46, %v1111_v42 }
 0x177   : > { %v488_v62 = vadd.f32 %v477_v58, %v456_v56  ;;  %v458_v63 = vmul.f32 %v450_v48, %v423_v60  ;;  %v425_v0 = vpop.f32.mrb[7].mxu0  ;;  %v652_v47 = vrot.slane %v648_v44, %v1111_v42  ;;  %v702_v17 = vrot.slane %v694_v46, %v1114_v43 }
 0x178   : > { %v489_v3 = vadd.f32 %v477_v58, %v457_v59  ;;  %v459_v4 = vmul.f32 %v450_v48, %v425_v0  ;;  %552 = vmatprep.subr.bf16.mxu0 %v501_v61  ;;  %916 = vmatprep.subr.bf16.mxu1 %v501_v61  ;;  %v656_v48 = vrot.slane %v648_v44, %v1114_v43  ;;  %vm689_vm11 = vcmp.lt.s32.totalorder %v1122_v45, 15 }
 0x179   : > { %v490_v5 = vadd.f32 %v482_v2, %v458_v63  ;;  %553 = vmatpush1.bf16.msra.mxu0 %v500_v55  ;;  %918 = vmatpush1.bf16.msra.mxu1 %v500_v55  ;;  %v496_v7 = vmax.f32 %v488_v62, 0.0  ;;  %vm657_vm9 = vcmp.eq.s32.totalorder %v652_v47, 1  ;;  %vm1134_vm12 = vcmp.eq.s32.totalorder %v698_v49, 1 }
 0x17a   : > { %v491_v6 = vadd.f32 %v482_v2, %v459_v4  ;;  %v497_v9 = vmax.f32 %v489_v3, 0.0  ;;  %vm658_vm10 = vcmp.eq.s32.totalorder %v656_v48, 1  ;;  %vm1138_vm13 = vcmp.eq.s32.totalorder %v702_v17, 1 }
 0x17b   : > { %v498_v8 = vmax.f32 %v490_v5, 0.0  ;;  %v674_v58 = vrot.slane %v670_v15, %v1111_v42  ;;  %v678_v62 = vrot.slane %v670_v15, %v1114_v43  ;;  %v716_v63 = vsel %vm646_vm4, 1, %v956_v1 }
 0x17c   : > { %v499_v10 = vmax.f32 %v491_v6, 0.0  ;;  %v738_v4 = vsel %vm692_vm5, 1, %v956_v1  ;;  %vm667_vm15 = vcmp.lt.s32.totalorder %v1122_v45, 16  ;;  %vm713_vm3 = vcmp.lt.s32.totalorder %v1122_v45, 1 }
 0x17d   : > { %v502_v11 = vpack.c.bf16 %v498_v8, %v496_v7  ;;  %v720_v7 = vrot.slane %v716_v63, %v1111_v42  ;;  %vm679_vm0 = vcmp.eq.s32.totalorder %v674_v58, 1  ;;  %vm680_vm1 = vcmp.eq.s32.totalorder %v678_v62, 1 }
 0x17e   : > { %v503_v12 = vpack.c.bf16 %v499_v10, %v497_v9  ;;  %v724_v9 = vrot.slane %v716_v63, %v1114_v43 }
 0x17f   : > { %vm1164_vm6 = vcmp.eq.s32.totalorder %v720_v7, 1 }
 0x180   : > { %554 = vmatprep.subr.bf16.mxu0 %v503_v12  ;;  %917 = vmatprep.subr.bf16.mxu1 %v503_v12  ;;  %vm726_vm7 = vcmp.eq.s32.totalorder %v724_v9, 1 }
 0x181   : > { %555 = vmatpush1.bf16.msra.mxu0 %v502_v11  ;;  %919 = vmatpush1.bf16.msra.mxu1 %v502_v11  ;;  %v742_v11 = vrot.slane %v738_v4, %v1111_v42 }
 0x184   : > { %906 = vmatmul.mubr.msk.bf16.vlgmr.msra.gmra.mrb[8].mxu0 %vm536_vm2, %v943_v13  ;;  %907 = vmatmul.mubr.msk.bf16.vlgmr.msra.gmra.mrb[0].mxu1 %vm536_vm2, %v944_v14 }
 0x185   : > { %604 = vmatprep.mubr.bf16.mxu1 %v956_v1 }
 0x18c   : > { %908 = vmatmul.mubr.msk.bf16.gmra.mrb[4].mxu1 %vm536_vm2, %v945_v16 }
 0x18d   : > { %614 = vmatprep.mubr.bf16.mxu1 %v956_v1 }
 0x194   : > { %909 = vmatmul.mubr.msk.bf16.gmra.mrb[8].mxu1 %vm536_vm2, %v946_v18 }
 0x195   : > { %624 = vmatprep.mubr.bf16.mxu1 %v956_v1 }
 0x19c   : > { %910 = vmatmul.mubr.msk.bf16.gmra.mrb[12].mxu1 %vm536_vm2, %v947_v19  ;;  %vm761_vm2 = vmand %vm760_vm14, %vm646_vm4  ;;  %v746_v19 = vrot.slane %v738_v4, %v1114_v43  ;;  %vm735_vm4 = vcmp.lt.s32.totalorder %v1122_v45, 127 }
 0x257   : > { %v586_v20 = vpop.f32.mrb[8].mxu0  ;;  %v596_v21 = vpop.f32.mrb[0].mxu1 }
 0x258   : > { %636 = vrot.lane.b32.xlu0 %v586_v20, %s958_s30  ;;  %v588_v22 = vpop.f32.mrb[9].mxu0  ;;  %v598_v23 = vpop.f32.mrb[1].mxu1 }
 0x259   : > { %638 = vrot.lane.b32.xlu1 %v588_v22, %s958_s30  ;;  %v590_v24 = vpop.f32.mrb[10].mxu0  ;;  %v600_v25 = vpop.f32.mrb[2].mxu1 }
 0x25a   : > { %v592_v26 = vpop.f32.mrb[11].mxu0  ;;  %v602_v27 = vpop.f32.mrb[3].mxu1 }
 0x25c   : > { %685 = vrot.lane.b32.xlu0 %v596_v21, %s959_s9 }
 0x25d   : > { %687 = vrot.lane.b32.xlu1 %v598_v23, %s959_s9  ;;  %v762_v23 = vsel %vm761_vm2, 1, %v956_v1 }
 0x25f   : > { %v606_v28 = vpop.f32.mrb[4].mxu1 }
 0x260   : > { %663 = vrot.lane.b32.xlu0 %v590_v24, %s960_s10  ;;  %v608_v29 = vpop.f32.mrb[5].mxu1 }
 0x261   : > { %665 = vrot.lane.b32.xlu1 %v592_v26, %s960_s10  ;;  %v610_v30 = vpop.f32.mrb[6].mxu1 }
 0x262   : > { %v612_v31 = vpop.f32.mrb[7].mxu1 }
 0x264   : > { %709 = vrot.lane.b32.xlu0 %v600_v25, %s961_s11 }
 0x265   : > { %711 = vrot.lane.b32.xlu1 %v602_v27, %s961_s11 }
 0x267   : > { %v616_v32 = vpop.f32.mrb[8].mxu1 }
 0x268   : > { %731 = vrot.lane.b32.xlu0 %v610_v30, %s962_s12  ;;  %v618_v33 = vpop.f32.mrb[9].mxu1 }
 0x269   : > { %733 = vrot.lane.b32.xlu1 %v612_v31, %s962_s12  ;;  %v620_v34 = vpop.f32.mrb[10].mxu1 }
 0x26a   : > { %v622_v35 = vpop.f32.mrb[11].mxu1 }
 0x26c   : > { %753 = vrot.lane.b32.xlu0 %v616_v32, %s963_s13 }
 0x26d   : > { %755 = vrot.lane.b32.xlu1 %v618_v33, %s963_s13  ;;  %v766_v33 = vrot.slane %v762_v23, %v1111_v42 }
 0x26f   : > { %v626_v36 = vpop.f32.mrb[12].mxu1 }
 0x270   : > { %777 = vrot.lane.b32.xlu0 %v620_v34, %s964_s14  ;;  %v628_v37 = vpop.f32.mrb[13].mxu1 }
 0x271   : > { %779 = vrot.lane.b32.xlu1 %v622_v35, %s964_s14  ;;  %v630_v38 = vpop.f32.mrb[14].mxu1 }
 0x272   : > { %v631_v39 = vpop.f32.mrb[15].mxu1  ;;  %v784_v38 = vsel %vm760_vm14, 1, %v956_v1 }
 0x273   : > { %v788_v49 = vrot.slane %v784_v38, %v1111_v42  ;;  %v792_v17 = vrot.slane %v784_v38, %v1114_v43 }
 0x274   : > { %799 = vrot.lane.b32.xlu0 %v626_v36, %s965_s15 }
 0x275   : > { %801 = vrot.lane.b32.xlu1 %v628_v37, %s965_s15  ;;  %v770_v37 = vrot.slane %v762_v23, %v1114_v43 }
 0x2ca   : > { %v637_v50 = vpop.permute.xlu0 %636 }
 0x2cb   : > { %v639_v51 = vpop.permute.xlu1 %638 }
 0x2cc   : > { %v643_v52 = vsel %vm642_vm8, %v637_v50, %v639_v51  ;;  %v644_v53 = vsel %vm642_vm8, %v639_v51, %v637_v50  ;;  %vm1171_vm8 = vcmp.eq.s32.totalorder %v742_v11, 1 }
 0x2cd   : > { %v659_v55 = vsel %vm657_vm9, %v644_v53, 0.0  ;;  %v660_v56 = vsel %vm658_vm10, %v643_v52, 0.0  ;;  %vm1181_vm9 = vcmp.eq.s32.totalorder %v746_v19, 1  ;;  %vm757_vm10 = vcmp.lt.s32.totalorder %v1122_v45, 113 }
 0x2ce   : > { %v661_v59 = vadd.f32 %v659_v55, %v606_v28  ;;  %v662_v60 = vadd.f32 %v660_v56, %v608_v29  ;;  %v686_v61 = vpop.permute.xlu0 %685 }
 0x2cf   : > { %v688_v0 = vpop.permute.xlu1 %687 }
 0x2d0   : > { %v690_v2 = vsel %vm689_vm11, %v686_v61, %v688_v0  ;;  %v691_v3 = vsel %vm689_vm11, %v688_v0, %v686_v61  ;;  %vm806_vm11 = vmand %vm760_vm14, %vm692_vm5  ;;  %vm781_vm5 = vcmp.lt.s32.totalorder %v1122_v45, 112  ;;  %vm793_vm14 = vcmp.eq.s32.totalorder %v788_v49, 1 }
 0x2d1   : > { %v705_v5 = vsel %vm1134_vm12, %v691_v3, 0.0  ;;  %v706_v6 = vsel %vm1138_vm13, %v690_v2, 0.0  ;;  %vm771_vm12 = vcmp.eq.s32.totalorder %v766_v33, 1  ;;  %vm772_vm13 = vcmp.eq.s32.totalorder %v770_v37, 1 }
 0x2d2   : > { %v664_v8 = vpop.permute.xlu0 %663  ;;  %v807_v41 = vsel %vm806_vm11, 1, %v956_v1 }
 0x2d3   : > { %v666_v10 = vpop.permute.xlu1 %665 }
 0x2d4   : > { %v668_v12 = vsel %vm667_vm15, %v664_v8, %v666_v10  ;;  %v669_v13 = vsel %vm667_vm15, %v666_v10, %v664_v8  ;;  %vm794_vm15 = vcmp.eq.s32.totalorder %v792_v17, 1 }
 0x2d5   : > { %v681_v14 = vsel %vm679_vm0, %v669_v13, 0.0  ;;  %v682_v16 = vsel %vm680_vm1, %v668_v12, 0.0  ;;  %vm803_vm0 = vcmp.lt.s32.totalorder %v1122_v45, 111 }
 0x2d6   : > { %v683_v20 = vadd.f32 %v681_v14, %v661_v59  ;;  %v684_v21 = vadd.f32 %v682_v16, %v662_v60  ;;  %v710_v22 = vpop.permute.xlu0 %709  ;;  %v811_v59 = vrot.slane %v807_v41, %v1111_v42  ;;  %v815_v60 = vrot.slane %v807_v41, %v1114_v43 }
 0x2d7   : > { %v712_v24 = vpop.permute.xlu1 %711 }
 0x2d8   : > { %v707_v26 = vadd.f32 %v705_v5, %v683_v20  ;;  %v708_v27 = vadd.f32 %v706_v6, %v684_v21  ;;  %v714_v28 = vsel %vm713_vm3, %v710_v22, %v712_v24  ;;  %v715_v29 = vsel %vm713_vm3, %v712_v24, %v710_v22 }
 0x2d9   : > { %v727_v30 = vsel %vm1164_vm6, %v715_v29, 0.0  ;;  %v728_v31 = vsel %vm726_vm7, %v714_v28, 0.0  ;;  %vm816_vm1 = vcmp.eq.s32.totalorder %v811_v59, 1  ;;  %vm817_vm2 = vcmp.eq.s32.totalorder %v815_v60, 1 }
 0x2da   : > { %v729_v34 = vadd.f32 %v727_v30, %v707_v26  ;;  %v730_v35 = vadd.f32 %v728_v31, %v708_v27  ;;  %v732_v36 = vpop.permute.xlu0 %731 }
 0x2db   : > { %v734_v39 = vpop.permute.xlu1 %733 }
 0x2dc   : > { %v736_v44 = vsel %vm735_vm4, %v732_v36, %v734_v39  ;;  %v737_v46 = vsel %vm735_vm4, %v734_v39, %v732_v36 }
 0x2dd   : > { %v749_v47 = vsel %vm1171_vm8, %v736_v44, 0.0  ;;  %v750_v48 = vsel %vm1181_vm9, %v737_v46, 0.0 }
 0x2de   : > { %v751_v50 = vadd.f32 %v749_v47, %v729_v34  ;;  %v752_v15 = vadd.f32 %v750_v48, %v730_v35  ;;  %v754_v51 = vpop.permute.xlu0 %753 }
 0x2df   : > { %v756_v52 = vpop.permute.xlu1 %755 }
 0x2e0   : > { %v758_v40 = vsel %vm757_vm10, %v754_v51, %v756_v52  ;;  %v759_v53 = vsel %vm757_vm10, %v756_v52, %v754_v51 }
 0x2e1   : > { %v773_v54 = vsel %vm771_vm12, %v758_v40, 0.0  ;;  %v774_v55 = vsel %vm772_vm13, %v759_v53, 0.0 }
 0x2e2   : > { %v775_v56 = vadd.f32 %v773_v54, %v751_v50  ;;  %v776_v57 = vadd.f32 %v774_v55, %v752_v15  ;;  %v778_v58 = vpop.permute.xlu0 %777 }
 0x2e3   : > { %v780_v61 = vpop.permute.xlu1 %779 }
 0x2e4   : > { %v782_v62 = vsel %vm781_vm5, %v778_v58, %v780_v61  ;;  %v783_v63 = vsel %vm781_vm5, %v780_v61, %v778_v58 }
 0x2e5   : > { %v795_v0 = vsel %vm793_vm14, %v782_v62, 0.0  ;;  %v796_v1 = vsel %vm794_vm15, %v783_v63, 0.0 }
 0x2e6   : > { %v797_v2 = vadd.f32 %v795_v0, %v775_v56  ;;  %v798_v3 = vadd.f32 %v796_v1, %v776_v57  ;;  %v800_v4 = vpop.permute.xlu0 %799 }
 0x2e7   : > { %v802_v5 = vpop.permute.xlu1 %801 }
 0x2e8   : > { %v804_v6 = vsel %vm803_vm0, %v800_v4, %v802_v5  ;;  %v805_v7 = vsel %vm803_vm0, %v802_v5, %v800_v4 }
 0x2e9   : > { %v818_v42 = vsel %vm816_vm1, %v804_v6, 0.0  ;;  %v819_v8 = vsel %vm817_vm2, %v805_v7, 0.0 }
 0x2ea   : > { %v820_v43 = vadd.f32 %v818_v42, %v797_v2  ;;  %v821_v9 = vadd.f32 %v819_v8, %v798_v3 }
 0x2ec   : > { %v824_v10 = vrot.slane %v820_v43, 4  ;;  %v825_v11 = vrot.slane %v821_v9, 4 }
 0x2ee   : > { %828 = vst [vmem:[%s1038_s20 + $0x10] ss:$-12 sps:$4 sm:$0xff] %v824_v10   ;;  %829 = vst [vmem:[%s1038_s20 + $0x18] ss:$-12 sps:$4 sm:$0xff] %v825_v11  }
 0x2ef PF: > { %s18_s27 = sadd.s32 1, %s954_s27  }
 0x2f0   : > { %p15_p4 = scmp.ge.s32.totalorder %s18_s27, 4  }
 0x2f2   :  { %17 = sbr.rel (!%p15_p4) target bundleno = 1 (0x1), region = 83 }

</bundles_post_ra>
